<compile_context>
chip_gen: v5e
topology: v5e:2x2
jax: 0.10.0
libtpu: 0.0.40
codegen_flags: <defaults>
</compile_context>

<pallas_src>
import jax
import jax.numpy as jnp
from jax.experimental import pallas as pl
from jax.experimental.pallas import tpu as pltpu

_TARGET_BLOCK_BYTES = 2 * 1024 * 1024   # ~2 MiB of f32 per input block
_VMEM_LIMIT_BYTES = 48 * 1024 * 1024    # > default scoped limit, < v7x 64 MiB


def _round_up(x: int, m: int) -> int:
    return (x + m - 1) // m * m


def _z_kernel(x_ref, o_ref):
    x = x_ref[...].astype(jnp.float32)
    s = x.shape[-1]
    # Single pass over the tile: sum and sum-of-squares together.
    sum_x = jnp.sum(x, axis=-1, keepdims=True)
    sum_xx = jnp.sum(x * x, axis=-1, keepdims=True)
    mean = sum_x * jnp.float32(1.0 / s)
    # torch.Tensor.std default is unbiased (divide by S-1). S == 1 -> 0/0 NaN,
    # matching the PyTorch behavior.
    var = (sum_xx - sum_x * mean) / jnp.float32(s - 1)
    o_ref[...] = ((x - mean) * jax.lax.rsqrt(var)).astype(o_ref.dtype)


def _minmax_kernel(x_ref, o_ref):
    x = x_ref[...].astype(jnp.float32)
    mn = jnp.min(x, axis=-1, keepdims=True)
    xs = x - mn
    # max of the shifted signal, exactly as in the torch in-place code.
    mx = jnp.max(xs, axis=-1, keepdims=True)
    # approx reciprocal lowers to the otherwise-idle EUP slot.
    o_ref[...] = (xs * pl.reciprocal(mx, approx=True)).astype(o_ref.dtype)


def sample_norm(x: jax.Array, norm: str) -> jax.Array:
    """Pallas implementation of SampleNorm.forward for x of shape [N, C, S]."""
    if norm not in ("z", "minmax"):
        raise ValueError(f"Unsupported mode {norm}, supported modes: z, minmax")
    if x.ndim != 3:
        raise ValueError("Only 1D data with shape [N, C, S] is supported")

    n, c, s = x.shape
    rows = n * c
    rows8 = _round_up(rows, 8)

    # Row tile: ~2 MiB of f32 per block, multiple of 8.
    tr = max(8, (_TARGET_BLOCK_BYTES // (4 * s)) // 8 * 8)
    # Keep at least 2 grid steps when there is enough data so v7x's two
    # TensorCores can both get a slice of the (parallel) grid.
    if rows8 >= 16:
        tr = min(tr, _round_up(rows8 // 2, 8))
    tr = min(tr, rows8)

    grid = (pl.cdiv(rows, tr),)   # partial edge block handled/masked by Pallas

    x2 = x.reshape(rows, s)
    kernel = _z_kernel if norm == "z" else _minmax_kernel

    out2 = pl.pallas_call(
        kernel,
        out_shape=jax.ShapeDtypeStruct((rows, s), x.dtype),
        grid_spec=pltpu.PrefetchScalarGridSpec(
            num_scalar_prefetch=0,
            grid=grid,
            in_specs=[pl.BlockSpec((tr, s), lambda i: (i, 0))],
            out_specs=pl.BlockSpec((tr, s), lambda i: (i, 0)),
        ),
        compiler_params=pltpu.CompilerParams(
            dimension_semantics=("parallel",),
            vmem_limit_bytes=_VMEM_LIMIT_BYTES,
        ),
    )(x2)

    return out2.reshape(n, c, s)


def _reference(x: jax.Array, norm: str) -> jax.Array:
    xf = x.astype(jnp.float32)
    if norm == "z":
        xc = xf - jnp.mean(xf, axis=-1, keepdims=True)
        std = jnp.sqrt(jnp.sum(xc * xc, axis=-1, keepdims=True) / (x.shape[-1] - 1))
        return (xc / std).astype(x.dtype)
    mn = jnp.min(xf, axis=-1, keepdims=True)
    xs = xf - mn
    mx = jnp.max(xs, axis=-1, keepdims=True)
    return (xs / mx).astype(x.dtype)


if __name__ == "__main__":
    key = jax.random.PRNGKey(0)
    ok = True

    # [N, C, S] test shapes: the module's forward only accepts 3-D inputs.
    test_cases = [
        (2, 4, 16),    # small, S < 128 (lane-sparse path)
        (3, 5, 128),   # rows (15) not a multiple of the row tile -> masked edge block
    ]
    # minmax uses the EUP approx reciprocal -> slightly looser tolerance.
    tols = {"z": 1e-4, "minmax": 2e-3}

    for shape in test_cases:
        key, sub = jax.random.split(key)
        x = jax.random.normal(sub, shape, dtype=jnp.float32)
        for mode in ("z", "minmax"):
            y = sample_norm(x, mode)
            jax.block_until_ready(y)
            y_ref = _reference(x, mode)
            tol = tols[mode]
            if not jnp.allclose(y, y_ref, atol=tol, rtol=tol):
                ok = False
                print(f"MISMATCH shape={shape} mode={mode}: max err "
                      f"{float(jnp.max(jnp.abs(y - y_ref)))}")

    if ok:
        print("KERNEL_OK")
</pallas_src>

<mosaic_0001>
module attributes {stable_mosaic.version = 11 : i64} {
  func.func @_z_kernel(%arg0: i32, %arg1: memref<8x16xf32, #tpu.memory_space<vmem>>, %arg2: memref<8x16xf32, #tpu.memory_space<vmem>>) attributes {dimension_semantics = [#tpu.dimension_semantics<parallel>], iteration_bounds = array<i64: 1>, scalar_prefetch = 0 : i64, scratch_operands = 0 : i64, tpu.core_type = #tpu.core_type<tc>, window_params = [{transform_indices = @transform_0, window_bounds = array<i64: 8, 16>}, {transform_indices = @transform_1, window_bounds = array<i64: 8, 16>}]} {
    %c0 = arith.constant 0 : index
    %c0_0 = arith.constant 0 : index
    %0 = vector.load %arg1[%c0, %c0_0] : memref<8x16xf32, #tpu.memory_space<vmem>>, vector<8x16xf32>
    %cst = arith.constant dense<0.000000e+00> : vector<8xf32>
    %1 = vector.multi_reduction <add>, %0, %cst [1] : vector<8x16xf32> to vector<8xf32>
    %2 = vector.shape_cast %1 : vector<8xf32> to vector<8x1xf32>
    %3 = arith.mulf %0, %0 : vector<8x16xf32>
    %cst_1 = arith.constant dense<0.000000e+00> : vector<8xf32>
    %4 = vector.multi_reduction <add>, %3, %cst_1 [1] : vector<8x16xf32> to vector<8xf32>
    %5 = vector.shape_cast %4 : vector<8xf32> to vector<8x1xf32>
    %cst_2 = arith.constant 6.250000e-02 : f32
    %6 = vector.broadcast %cst_2 : f32 to vector<8x1xf32>
    %7 = arith.mulf %2, %6 : vector<8x1xf32>
    %8 = arith.mulf %2, %7 : vector<8x1xf32>
    %9 = arith.subf %5, %8 : vector<8x1xf32>
    %cst_3 = arith.constant 1.500000e+01 : f32
    %10 = vector.broadcast %cst_3 : f32 to vector<8x1xf32>
    %11 = arith.divf %9, %10 : vector<8x1xf32>
    %12 = vector.broadcast %7 : vector<8x1xf32> to vector<8x16xf32>
    %13 = arith.subf %0, %12 : vector<8x16xf32>
    %14 = math.rsqrt %11 : vector<8x1xf32>
    %15 = vector.broadcast %14 : vector<8x1xf32> to vector<8x16xf32>
    %16 = arith.mulf %13, %15 : vector<8x16xf32>
    %c0_4 = arith.constant 0 : index
    %c0_5 = arith.constant 0 : index
    %17 = vector.load %arg2[%c0_4, %c0_5] : memref<8x16xf32, #tpu.memory_space<vmem>>, vector<8x16xf32>
    tpu.vector_store %arg2[%c0_4, %c0_5], %16 {strides = array<i32>} : memref<8x16xf32, #tpu.memory_space<vmem>>, vector<8x16xf32>,
    return
  }
  func.func @transform_0(%arg0: i32) -> (i32, i32) {
    %c0_i32 = arith.constant 0 : i32
    %c0_i32_0 = arith.constant 0 : i32
    return %arg0, %c0_i32 : i32, i32
  }
  func.func @transform_1(%arg0: i32) -> (i32, i32) {
    %c0_i32 = arith.constant 0 : i32
    %c0_i32_0 = arith.constant 0 : i32
    return %arg0, %c0_i32 : i32, i32
  }
}

</mosaic_0001>

<bundles_post_ra>
// kernel: tpu_custom_call.1
= control target key start
LH: loop header
LB: loop body
LE: loop exit
PB: predicated region body
PF: predicated region fallthrough
CT: control target
= control target key end

     0   :  { %6 = vsyncpa [#allocation3], 0  ;;  %s154_s0 = inlined_call_operand.hbm [shape: f32[8,16], index: 0, kind: input, shape index: {}]   ;;  %s155_s1 = inlined_call_operand.hbm [shape: f32[8,16], index: 1, kind: output, shape index: {}]  }
   0x1   :  { %7 = vsyncpa [#allocation4], 0  ;;  %s13_s8 = sshll.u32 %s154_s0, 4  ;;  %s132_s9 = smov [#allocation2]   ;;  %s14_s8 = int_to_ptr.hbm [resolvable:$true] %s13_s8 }
   0x2   :  { %s15_s10 = sshll.u32 %s132_s9, 4  ;;  %s16_s10 = int_to_ptr.vmem [resolvable:$true] %s15_s10 }
   0x3   :  { %18 = dma.hbm_to_vmem [thread:$0]  %s14_s8, 128, %s16_s10, [#allocation3]  }
   0x4   :  { %128 = dma.done.wait [#allocation3], 128  }
   0x5   :  { %129 = vsyncadd [#allocation3], 4294967168  ;;  %vm24_vm0 = vcmask 130048   ;;  %v23_v0 = vld [vmem:[#allocation2] sm:$0xff]  ;;  %v133_v4 = vmov 15.0   ;;  %s134_s0 = smov [#allocation5]  }
   0x6   :  { %v25_v1 = vsel %vm24_vm0, %v23_v0, 0.0  ;;  %v28_v2 = vmul.f32 %v23_v0, %v23_v0  ;;  %76 = vrcp.f32 %v133_v4  ;;  %s61_s11 = sshll.u32 %s134_s0, 4  ;;  %s63_s14 = sshll.u32 %s155_s1, 4  ;;  %s62_s11 = int_to_ptr.vmem [resolvable:$true] %s61_s11  ;;  %s64_s14 = int_to_ptr.hbm [resolvable:$true] %s63_s14 }
   0x7   :  { %26 = vadd.xlane.f32.xlu0 %v25_v1 }
   0x8   :  { %v29_v3 = vsel %vm24_vm0, %v28_v2, 0.0 }
   0xc   :  { %v77_v5 = vpop.eup %76 }
   0xd   :  { %v36_v6 = vmul.f32 15.0, %v77_v5  ;;  %vm40_vm1 = vweird.f32 %v77_v5 }
   0xf   :  { %30 = vadd.xlane.f32.xlu0 %v29_v3  ;;  %v37_v7 = vsub.f32 1.0, %v36_v6 }
  0x11   :  { %v38_v9 = vmul.f32 %v77_v5, %v37_v7 }
  0x13   :  { %v39_v11 = vadd.f32 %v77_v5, %v38_v9 }
  0x15   :  { %v41_v13 = vsel %vm40_vm1, %v77_v5, %v39_v11 }
  0x7a   :  { %v27_v8 = vpop.xlane.xlu0 %26 }
  0x7b   :  { %v32_v10 = vmul.f32 0.0625, %v27_v8 }
  0x7d   :  { %v33_v12 = vmul.f32 %v32_v10, %v27_v8  ;;  %v43_v23 = vsub.f32 %v23_v0, %v32_v10 }
  0x82   :  { %v31_v14 = vpop.xlane.xlu0 %30 }
  0x83   :  { %v34_v15 = vsub.f32 %v31_v14, %v33_v12 }
  0x85   :  { %v42_v16 = vmul.f32 %v41_v13, %v34_v15 }
  0x87   :  { %78 = vrsqrt.f32 %v42_v16  ;;  %vm50_vm3 = vweird.f32 %v42_v16 }
  0x8d   :  { %v79_v17 = vpop.eup %78 }
  0x8e   :  { %v45_v18 = vmul.f32 %v79_v17, %v42_v16  ;;  %vm51_vm2 = vweird.f32 %v79_v17 }
  0x8f   :  { %vm52_vm4 = vmor %vm50_vm3, %vm51_vm2 }
  0x90   :  { %v46_v19 = vmul.f32 %v79_v17, %v45_v18 }
  0x92   :  { %v47_v20 = vmul.f32 0.5, %v46_v19 }
  0x94   :  { %v48_v21 = vsub.f32 1.5, %v47_v20 }
  0x96   :  { %v49_v22 = vmul.f32 %v79_v17, %v48_v21 }
  0x98   :  { %v53_v24 = vsel %vm52_vm4, %v79_v17, %v49_v22 }
  0x99   :  { %v54_v25 = vmul.f32 %v53_v24, %v43_v23 }
  0x9b   :  { %55 = vst.msk [vmem:[#allocation5] sm:$0xff] %vm24_vm0, %v54_v25 }
  0x9c   :  { %66 = dma.vmem_to_hbm [thread:$0]  %s62_s11, 128, %s64_s14, [#allocation4]  }
  0x9d   :  { %130 = dma.done.wait [#allocation4], 128  }
  0x9e   :  { %131 = vsyncadd [#allocation4], 4294967168 }
  0x9f   :  { %71 = vsyncpa [#allocation3], 1 }
  0xa0   :  { %72 = vsyncpa [#allocation4], 1 }

</bundles_post_ra>
